<compile_context>
chip_gen: v7x
topology: tpu7x:2x2x1
jax: 0.10.0
libtpu: 0.0.40
codegen_flags: <defaults>
</compile_context>

<pallas_src>
import jax
import jax.numpy as jnp
from jax.experimental import pallas as pl
from jax.experimental.pallas import tpu as pltpu


def _patch_embed_kernel(x_ref, w_ref, tbl_ref, o_ref):
    # x_ref  : (TB, C, TL)   native NCL input block (no wrapper transpose)
    # w_ref  : (C,  E)       proj weight, (in_features, out_features)
    # tbl_ref: (TL, E) f32   pos_embed[1 + l_off : 1 + l_off + TL] + bias
    # o_ref  : (TB, TL, E)   patch-token output block (cls row added outside)
    w = w_ref[...]
    tbl = tbl_ref[...]
    for bb in range(x_ref.shape[0]):            # static unroll over batch rows
        xb = x_ref[bb]                          # (C, TL)
        # Contract over C (dim 0 of both operands): transposed-LHS MXU matmul,
        # f32 accumulation.
        y = jax.lax.dot_general(
            xb, w,
            dimension_numbers=(((0,), (0,)), ((), ())),
            preferred_element_type=jnp.float32)  # (TL, E) f32
        o_ref[bb] = (y + tbl).astype(o_ref.dtype)


def _choose_b_tile(B, cap=8):
    for t in range(min(B, cap), 0, -1):
        if B % t == 0:
            return t
    return 1


def _choose_l_tile(L, cap=512):
    if L <= cap:
        return L                                # full-extent block is always legal
    for t in range(cap, 0, -1):
        if L % t == 0 and t % 128 == 0:         # lane-aligned partial blocks only
            return t
    return L


def patch_embed_1d(x, w, b, cls_token, pos_embed, *, patch_size):
    """Forward of PatchEmbed1D.

    x: (B, C, L) in native NCL layout, w: (E, C_in) PyTorch Linear weight with
    C_in == patch_size * in_chans == C, b: (E,), cls_token: (1, 1, E),
    pos_embed: (1, num_patches + 1, E).  Returns (B, L + 1, E) in x.dtype.
    """
    B, C, L = x.shape
    E = w.shape[0]
    assert L % patch_size == 0, "L must be divisible by patch_size (torch .view)"
    assert w.shape[1] == C, "Linear in_features must equal C (patch_size*in_chans)"
    assert L + 1 <= pos_embed.shape[1], "L+1 must fit in pos_embed"
    assert E % 128 == 0, "embed_dim should be lane-aligned (multiple of 128)"

    out_dtype = x.dtype
    w_t = jnp.transpose(w, (1, 0)).astype(x.dtype)                # (C, E), tiny
    # Fold bias + pos_embed rows 1..L into one f32 additive table.
    tbl = (pos_embed[0, 1:L + 1, :].astype(jnp.float32)
           + b.reshape(1, E).astype(jnp.float32))                 # (L, E) f32

    TB = _choose_b_tile(B)
    TL = _choose_l_tile(L)
    grid = (B // TB, L // TL)

    patches = pl.pallas_call(
        _patch_embed_kernel,
        out_shape=jax.ShapeDtypeStruct((B, L, E), out_dtype),
        grid_spec=pltpu.PrefetchScalarGridSpec(
            num_scalar_prefetch=0,
            grid=grid,
            in_specs=[
                pl.BlockSpec((TB, C, TL), lambda ib, il: (ib, 0, il)),
                pl.BlockSpec((C, E), lambda ib, il: (0, 0)),
                pl.BlockSpec((TL, E), lambda ib, il: (il, 0)),
            ],
            out_specs=pl.BlockSpec((TB, TL, E), lambda ib, il: (ib, il, 0)),
        ),
        compiler_params=pltpu.CompilerParams(
            dimension_semantics=("parallel", "parallel"),
            vmem_limit_bytes=64 * 1024 * 1024,
        ),
    )(x, w_t, tbl)

    # Batch-independent cls row: cls_token + pos_embed[:, 0]; prepend outside
    # the kernel so the kernel's stores stay sublane-aligned.
    cls_row = (cls_token.reshape(1, 1, E).astype(jnp.float32)
               + pos_embed[:, :1, :].astype(jnp.float32)).astype(out_dtype)
    cls_rows = jnp.broadcast_to(cls_row, (B, 1, E))
    return jnp.concatenate([cls_rows, patches], axis=1)           # (B, L+1, E)


if __name__ == "__main__":
    # Small hyperparameters consistent with the module's forward constraints:
    # C == patch_size * in_chans, L % patch_size == 0, L <= seq_len // patch_size.
    seq_len, patch_size, in_chans, embed_dim = 1024, 8, 1, 256
    num_patches = seq_len // patch_size                           # 128
    B = 4
    C = patch_size * in_chans                                     # 8
    L = 128                                                       # multiple of patch_size, <= num_patches

    key = jax.random.PRNGKey(0)
    kx, kw, kb, kc, kp = jax.random.split(key, 5)
    x32 = jax.random.normal(kx, (B, C, L), jnp.float32)
    # nn.Linear(patch_size*in_chans, embed_dim): weight (E, C_in), bias (E,)
    w32 = jax.random.normal(kw, (embed_dim, C), jnp.float32) * 0.02
    b32 = jax.random.normal(kb, (embed_dim,), jnp.float32) * 0.02
    # __init__ zero-inits these; use small values so the adds are exercised.
    cls32 = jax.random.normal(kc, (1, 1, embed_dim), jnp.float32) * 0.02
    pos32 = jax.random.normal(kp, (1, num_patches + 1, embed_dim), jnp.float32) * 0.02

    # Plain-JAX reference mirroring the PyTorch forward line by line (f32).
    xr = x32.reshape(B, C, L // patch_size, patch_size).reshape(B, C, L)  # view + flatten(2)
    xr = jnp.transpose(xr, (0, 2, 1))                                     # transpose(1, 2)
    yr = xr @ w32.T + b32                                                 # proj
    ref = jnp.concatenate(
        [jnp.broadcast_to(cls32, (B, 1, embed_dim)), yr], axis=1)         # cat cls
    ref = ref + pos32[:, : L + 1]                                         # + pos_embed

    # f32 path (tight tolerance).
    out_f32 = patch_embed_1d(x32, w32, b32, cls32, pos32, patch_size=patch_size)
    out_f32 = jax.block_until_ready(out_f32)
    assert out_f32.shape == (B, L + 1, embed_dim)
    assert out_f32.dtype == jnp.float32
    assert jnp.allclose(out_f32, ref, atol=1e-4, rtol=1e-4), "f32 mismatch vs reference"

    # bf16 activation path (bandwidth-optimized) vs f32 reference, loose tolerance.
    out_bf16 = patch_embed_1d(x32.astype(jnp.bfloat16), w32.astype(jnp.bfloat16),
                              b32, cls32, pos32, patch_size=patch_size)
    out_bf16 = jax.block_until_ready(out_bf16)
    assert out_bf16.shape == (B, L + 1, embed_dim)
    assert out_bf16.dtype == jnp.bfloat16
    assert jnp.allclose(out_bf16.astype(jnp.float32), ref, atol=3e-2, rtol=3e-2), \
        "bf16 mismatch vs reference"

    print("KERNEL_OK")
</pallas_src>

<mosaic_0001>
module attributes {stable_mosaic.version = 11 : i64} {
  func.func @_patch_embed_kernel(%arg0: i32, %arg1: i32, %arg2: memref<4x8x128xf32, #tpu.memory_space<vmem>>, %arg3: memref<8x256xf32, #tpu.memory_space<vmem>>, %arg4: memref<128x256xf32, #tpu.memory_space<vmem>>, %arg5: memref<4x128x256xf32, #tpu.memory_space<vmem>>) attributes {dimension_semantics = [#tpu.dimension_semantics<parallel>, #tpu.dimension_semantics<parallel>], iteration_bounds = array<i64: 1, 1>, scalar_prefetch = 0 : i64, scratch_operands = 0 : i64, tpu.core_type = #tpu.core_type<tc>, window_params = [{transform_indices = @transform_0, window_bounds = array<i64: 4, 8, 128>}, {pipeline_mode = #tpu.pipeline_mode<synchronous>, transform_indices = @transform_1, window_bounds = array<i64: 8, 256>}, {transform_indices = @transform_2, window_bounds = array<i64: 128, 256>}, {transform_indices = @transform_3, window_bounds = array<i64: 4, 128, 256>}]} {
    %c0 = arith.constant 0 : index
    %c0_0 = arith.constant 0 : index
    %0 = vector.load %arg3[%c0, %c0_0] : memref<8x256xf32, #tpu.memory_space<vmem>>, vector<8x256xf32>
    %c0_1 = arith.constant 0 : index
    %c0_2 = arith.constant 0 : index
    %1 = vector.load %arg4[%c0_1, %c0_2] : memref<128x256xf32, #tpu.memory_space<vmem>>, vector<128x256xf32>
    %c0_3 = arith.constant 0 : index
    %c0_4 = arith.constant 0 : index
    %c0_5 = arith.constant 0 : index
    %2 = vector.load %arg2[%c0_3, %c0_4, %c0_5] : memref<4x8x128xf32, #tpu.memory_space<vmem>>, vector<1x8x128xf32>
    %3 = vector.shape_cast %2 : vector<1x8x128xf32> to vector<8x128xf32>
    %cst = arith.constant dense<0.000000e+00> : vector<128x256xf32>
    %4 = tpu.matmul %3, %0, %cst {dimension_numbers = #tpu.dot_dimension_numbers<[0], [0], [1], [1], [0, 1, 1, 1], [], []>} : vector<8x128xf32>, vector<8x256xf32>, vector<128x256xf32> -> vector<128x256xf32>
    %5 = arith.addf %4, %1 : vector<128x256xf32>
    %c0_6 = arith.constant 0 : index
    %c0_7 = arith.constant 0 : index
    %c0_8 = arith.constant 0 : index
    %6 = vector.load %arg5[%c0_6, %c0_7, %c0_8] : memref<4x128x256xf32, #tpu.memory_space<vmem>>, vector<1x128x256xf32>
    %7 = vector.shape_cast %6 : vector<1x128x256xf32> to vector<128x256xf32>
    %8 = vector.shape_cast %5 : vector<128x256xf32> to vector<1x128x256xf32>
    tpu.vector_store %arg5[%c0_6, %c0_7, %c0_8], %8 {strides = array<i32>} : memref<4x128x256xf32, #tpu.memory_space<vmem>>, vector<1x128x256xf32>,
    %c1 = arith.constant 1 : index
    %c0_9 = arith.constant 0 : index
    %c0_10 = arith.constant 0 : index
    %9 = vector.load %arg2[%c1, %c0_9, %c0_10] : memref<4x8x128xf32, #tpu.memory_space<vmem>>, vector<1x8x128xf32>
    %10 = vector.shape_cast %9 : vector<1x8x128xf32> to vector<8x128xf32>
    %cst_11 = arith.constant dense<0.000000e+00> : vector<128x256xf32>
    %11 = tpu.matmul %10, %0, %cst_11 {dimension_numbers = #tpu.dot_dimension_numbers<[0], [0], [1], [1], [0, 1, 1, 1], [], []>} : vector<8x128xf32>, vector<8x256xf32>, vector<128x256xf32> -> vector<128x256xf32>
    %12 = arith.addf %11, %1 : vector<128x256xf32>
    %c1_12 = arith.constant 1 : index
    %c0_13 = arith.constant 0 : index
    %c0_14 = arith.constant 0 : index
    %13 = vector.load %arg5[%c1_12, %c0_13, %c0_14] : memref<4x128x256xf32, #tpu.memory_space<vmem>>, vector<1x128x256xf32>
    %14 = vector.shape_cast %13 : vector<1x128x256xf32> to vector<128x256xf32>
    %15 = vector.shape_cast %12 : vector<128x256xf32> to vector<1x128x256xf32>
    tpu.vector_store %arg5[%c1_12, %c0_13, %c0_14], %15 {strides = array<i32>} : memref<4x128x256xf32, #tpu.memory_space<vmem>>, vector<1x128x256xf32>,
    %c2 = arith.constant 2 : index
    %c0_15 = arith.constant 0 : index
    %c0_16 = arith.constant 0 : index
    %16 = vector.load %arg2[%c2, %c0_15, %c0_16] : memref<4x8x128xf32, #tpu.memory_space<vmem>>, vector<1x8x128xf32>
    %17 = vector.shape_cast %16 : vector<1x8x128xf32> to vector<8x128xf32>
    %cst_17 = arith.constant dense<0.000000e+00> : vector<128x256xf32>
    %18 = tpu.matmul %17, %0, %cst_17 {dimension_numbers = #tpu.dot_dimension_numbers<[0], [0], [1], [1], [0, 1, 1, 1], [], []>} : vector<8x128xf32>, vector<8x256xf32>, vector<128x256xf32> -> vector<128x256xf32>
    %19 = arith.addf %18, %1 : vector<128x256xf32>
    %c2_18 = arith.constant 2 : index
    %c0_19 = arith.constant 0 : index
    %c0_20 = arith.constant 0 : index
    %20 = vector.load %arg5[%c2_18, %c0_19, %c0_20] : memref<4x128x256xf32, #tpu.memory_space<vmem>>, vector<1x128x256xf32>
    %21 = vector.shape_cast %20 : vector<1x128x256xf32> to vector<128x256xf32>
    %22 = vector.shape_cast %19 : vector<128x256xf32> to vector<1x128x256xf32>
    tpu.vector_store %arg5[%c2_18, %c0_19, %c0_20], %22 {strides = array<i32>} : memref<4x128x256xf32, #tpu.memory_space<vmem>>, vector<1x128x256xf32>,
    %c3 = arith.constant 3 : index
    %c0_21 = arith.constant 0 : index
    %c0_22 = arith.constant 0 : index
    %23 = vector.load %arg2[%c3, %c0_21, %c0_22] : memref<4x8x128xf32, #tpu.memory_space<vmem>>, vector<1x8x128xf32>
    %24 = vector.shape_cast %23 : vector<1x8x128xf32> to vector<8x128xf32>
    %cst_23 = arith.constant dense<0.000000e+00> : vector<128x256xf32>
    %25 = tpu.matmul %24, %0, %cst_23 {dimension_numbers = #tpu.dot_dimension_numbers<[0], [0], [1], [1], [0, 1, 1, 1], [], []>} : vector<8x128xf32>, vector<8x256xf32>, vector<128x256xf32> -> vector<128x256xf32>
    %26 = arith.addf %25, %1 : vector<128x256xf32>
    %c3_24 = arith.constant 3 : index
    %c0_25 = arith.constant 0 : index
    %c0_26 = arith.constant 0 : index
    %27 = vector.load %arg5[%c3_24, %c0_25, %c0_26] : memref<4x128x256xf32, #tpu.memory_space<vmem>>, vector<1x128x256xf32>
    %28 = vector.shape_cast %27 : vector<1x128x256xf32> to vector<128x256xf32>
    %29 = vector.shape_cast %26 : vector<128x256xf32> to vector<1x128x256xf32>
    tpu.vector_store %arg5[%c3_24, %c0_25, %c0_26], %29 {strides = array<i32>} : memref<4x128x256xf32, #tpu.memory_space<vmem>>, vector<1x128x256xf32>,
    return
  }
  func.func @transform_0(%arg0: i32, %arg1: i32) -> (i32, i32, i32) {
    %c0_i32 = arith.constant 0 : i32
    %c0_i32_0 = arith.constant 0 : i32
    return %arg0, %c0_i32, %arg1 : i32, i32, i32
  }
  func.func @transform_1(%arg0: i32, %arg1: i32) -> (i32, i32) {
    %c0_i32 = arith.constant 0 : i32
    %c0_i32_0 = arith.constant 0 : i32
    %c0_i32_1 = arith.constant 0 : i32
    return %c0_i32, %c0_i32_0 : i32, i32
  }
  func.func @transform_2(%arg0: i32, %arg1: i32) -> (i32, i32) {
    %c0_i32 = arith.constant 0 : i32
    %c0_i32_0 = arith.constant 0 : i32
    return %arg1, %c0_i32 : i32, i32
  }
  func.func @transform_3(%arg0: i32, %arg1: i32) -> (i32, i32, i32) {
    %c0_i32 = arith.constant 0 : i32
    %c0_i32_0 = arith.constant 0 : i32
    return %arg0, %arg1, %c0_i32 : i32, i32, i32
  }
}

</mosaic_0001>

<bundles_post_ra>
// kernel: tpu_custom_call.1
= control target key start
LH: loop header
LB: loop body
LE: loop exit
PB: predicated region body
PF: predicated region fallthrough
CT: control target
= control target key end

     0   :  { %8 = vsyncpa [#allocation3], 0  ;;  %s1798_s0 = inlined_call_operand.hbm [shape: f32[4,8,128], index: 0, kind: input, shape index: {}]   ;;  %s1799_s1 = inlined_call_operand.hbm [shape: f32[8,256], index: 1, kind: input, shape index: {}]   ;;  %s1800_s2 = inlined_call_operand.hbm [shape: f32[128,256], index: 2, kind: input, shape index: {}]   ;;  %s1801_s3 = inlined_call_operand.hbm [shape: f32[4,128,256], index: 3, kind: output, shape index: {}]  }
   0x1   :  { %9 = vsyncpa [#allocation6], 0 }
   0x2   :  { %10 = vsyncpa [#allocation4], 0  ;;  %s1376_s12 = smov [#allocation5]   ;;  %s1377_s14 = smov [#allocation2]  }
   0x3   :  { %s29_s13 = sshll.u32 %s1376_s12, 4  ;;  %s16_s15 = sshll.u32 %s1377_s14, 4  ;;  %s30_s13 = int_to_ptr.vmem [resolvable:$true] %s29_s13  ;;  %s1405_s15 = int_to_ptr.vmem [resolvable:$true] %s16_s15 }
   0x4   :  { %s1282_s18 = scalar_lea.hbm %s1799_s1, 256 }
   0x5   :  { %p1283_p0 = scmp.ne.s32.totalorder %s1799_s1, %s1282_s18  ;;  %p1286_p1 = scmp.lt.u32.totalorder %s1282_s18, %s1799_s1 }
   0x7   :  { %p1288_p2 = pnand %p1286_p1, %p1283_p0 }
   0x9   :  { %1291 = shalt.err (!%p1288_p2)
}
   0xa   :  { %s1292_s23 = scalar_lea.vmem %s30_s13, 256  ;;  %p1297_p4 = scmp.lt.s32.totalorder %s30_s13, %s30_s13 }
   0xb   :  { %p1293_p3 = scmp.ne.s32.totalorder %s30_s13, %s1292_s23  ;;  %p1298_p5 = scmp.lt.s32.totalorder %s1292_s23, %s1292_s23 }
   0xd   :  { %p1299_p6 = por %p1298_p5, %p1297_p4 }
   0xf   :  { %p1300_p7 = pnand %p1299_p6, %p1293_p3 }
  0x11   :  { %1303 = shalt.err (!%p1300_p7)
}
  0x12   :  { %32 = dma.hbm_to_vmem [thread:$0]  %s1799_s1, 256, %s30_s13, [#allocation6]  }
  0x13   :  { %s1304_s28 = scalar_lea.hbm %s1798_s0, 512 }
  0x14   :  { %p1305_p8 = scmp.ne.s32.totalorder %s1798_s0, %s1304_s28  ;;  %p1308_p9 = scmp.lt.u32.totalorder %s1304_s28, %s1798_s0 }
  0x16   :  { %p1310_p10 = pnand %p1308_p9, %p1305_p8 }
  0x18   :  { %1313 = shalt.err (!%p1310_p10)
}
  0x19   :  { %s1314_s6 = scalar_lea.vmem %s1405_s15, 512  ;;  %p1319_p12 = scmp.lt.s32.totalorder %s1405_s15, %s1405_s15 }
  0x1a   :  { %p1315_p11 = scmp.ne.s32.totalorder %s1405_s15, %s1314_s6  ;;  %p1320_p13 = scmp.lt.s32.totalorder %s1314_s6, %s1314_s6 }
  0x1c   :  { %p1321_p0 = por %p1320_p13, %p1319_p12 }
  0x1e   :  { %p1322_p1 = pnand %p1321_p0, %p1315_p11 }
  0x20   :  { %1325 = shalt.err (!%p1322_p1)
}
  0x21   :  { %s1378_s1 = smov 128   ;;  %s1379_s7 = smov 8  }
  0x22   :  { %22 = dma.hbm_to_vmem [thread:$0]  %s1798_s0, 512, %s1405_s15, [#allocation3], %s1378_s1, %s1378_s1, %s1379_s7  }
  0x23   :  { %s1380_s10 = smov [#allocation7]   ;;  %s1326_s14 = scalar_lea.hbm %s1800_s2, 4096 }
  0x24   :  { %s38_s11 = sshll.u32 %s1380_s10, 4  ;;  %p1327_p2 = scmp.ne.s32.totalorder %s1800_s2, %s1326_s14  ;;  %s39_s11 = int_to_ptr.vmem [resolvable:$true] %s38_s11 }
  0x25   :  { %p1330_p3 = scmp.lt.u32.totalorder %s1326_s14, %s1800_s2 }
  0x27   :  { %p1332_p4 = pnand %p1330_p3, %p1327_p2 }
  0x29   :  { %1335 = shalt.err (!%p1332_p4)
}
  0x2a   :  { %s1336_s20 = scalar_lea.vmem %s39_s11, 4096  ;;  %p1341_p6 = scmp.lt.s32.totalorder %s39_s11, %s39_s11 }
  0x2b   :  { %p1337_p5 = scmp.ne.s32.totalorder %s39_s11, %s1336_s20  ;;  %p1342_p7 = scmp.lt.s32.totalorder %s1336_s20, %s1336_s20 }
  0x2d   :  { %p1343_p8 = por %p1342_p7, %p1341_p6 }
  0x2f   :  { %p1344_p9 = pnand %p1343_p8, %p1337_p5 }
  0x31   :  { %1347 = shalt.err (!%p1344_p9)
}
  0x32   :  { %s1381_s0 = smov 256   ;;  %s1382_s15 = smov 16  }
  0x33   :  { %44 = dma.hbm_to_vmem [thread:$0]  %s1800_s2, 4096, %s39_s11, [#allocation6], %s1381_s0, %s1381_s0, %s1382_s15  }
  0x34   :  { %1370 = dma.done.wait [#allocation3], 512  }
  0x35   :  { %1371 = vsyncadd [#allocation3], 4294966784 }
  0x36   :  { %1372 = dma.done.wait [#allocation6], 4352  }
  0x37   :  { %1373 = vsyncadd [#allocation6], 4294962944  ;;  %v1383_v0 = vmov 0.0   ;;  %v88_v1 = vld [vmem:[#allocation2] sm:$0xff]  ;;  %v640_v2 = vld [vmem:[#allocation2 + $0x10] sm:$0xff]  ;;  %vm121_vm0 = vcmask 64512  }
  0x38   :  { %234 = vmatprep.mubr.f32.mxu0 %v1383_v0  ;;  %509 = vmatprep.mubr.f32.mxu1 %v1383_v0  ;;  %v55_v3 = vld [vmem:[#allocation5 + $0x8] sm:$0xff]  ;;  %v1453_v4 = vld [vmem:[#allocation5] sm:$0xff]  ;;  %v916_v6 = vld [vmem:[#allocation2 + $0x18] sm:$0xff]  ;;  %s1384_s2 = smov [#allocation8]  }
  0x39   :  { %89 = vxpose.xlu0.b32.start.end [1/1] (short) %v88_v1, 128  ;;  %641 = vxpose.xlu1.b32.start.end [1/1] (short) %v640_v2, 128  ;;  %v364_v5 = vld [vmem:[#allocation2 + $0x8] sm:$0xff]  ;;  %s1196_s23 = sshll.u32 %s1384_s2, 4  ;;  %s1197_s23 = int_to_ptr.vmem [resolvable:$true] %s1196_s23 }
  0x3a   :  { %170 = vmatprep.subr.mxu0 %v55_v3  ;;  %445 = vmatprep.subr.mxu1 %v55_v3  ;;  %s1348_s24 = scalar_lea.vmem %s1197_s23, 16384  ;;  %p1353_p11 = scmp.lt.s32.totalorder %s1197_s23, %s1197_s23 }
  0x3b   :  { %171 = vmatpush1.msra.mxu0 %v1453_v4  ;;  %446 = vmatpush1.msra.mxu1 %v1453_v4  ;;  %p1349_p10 = scmp.ne.s32.totalorder %s1197_s23, %s1348_s24  ;;  %p1354_p12 = scmp.lt.s32.totalorder %s1348_s24, %s1348_s24 }
  0x3c   :  { %721 = vmatprep.subr.mxu0 %v55_v3  ;;  %997 = vmatprep.subr.mxu1 %v55_v3 }
  0x3d   :  { %p1355_p13 = por %p1354_p12, %p1353_p11 }
  0x3f   :  { %p1356_p0 = pnand %p1355_p13, %p1349_p10 }
  0x76   :  { %365 = vxpose.xlu0.b32.start.end [1/1] (short) %v364_v5, 128  ;;  %917 = vxpose.xlu1.b32.start.end [1/1] (short) %v916_v6, 128 }
  0xb9   :  { %v105_v7 = vpop.trf.xlu0  ;;  %v657_v8 = vpop.trf.xlu1 }
  0xba   :  { %1209 = vmatmul.mubr.msk.f32.vlgmr.msra.gmra.mrb[0].mxu0 %vm121_vm0, %v105_v7 }
  0xbb   :  { %240 = vmatprep.mubr.f32.mxu0 %v1383_v0  ;;  %722 = vmatpush1.msra.mxu0 %v1453_v4 }
  0xbd   :  { %v106_v9 = vpop.trf.xlu0  ;;  %v658_v10 = vpop.trf.xlu1 }
  0xbe   :  { %1210 = vmatmul.mubr.msk.f32.gmra.mrb[2].mxu0 %vm121_vm0, %v106_v9  ;;  %v1593_v9 = vld [vmem:[#allocation7 + $0x8] sm:$0xff] }
  0xbf   :  { %246 = vmatprep.mubr.f32.mxu0 %v1383_v0 }
  0xc1   :  { %v107_v11 = vpop.trf.xlu0  ;;  %v659_v13 = vpop.trf.xlu1 }
  0xc2   :  { %1211 = vmatmul.mubr.msk.f32.gmra.mrb[4].mxu0 %vm121_vm0, %v107_v11 }
  0xc3   :  { %252 = vmatprep.mubr.f32.mxu0 %v1383_v0 }
  0xc5   :  { %v108_v12 = vpop.trf.xlu0  ;;  %v660_v15 = vpop.trf.xlu1 }
  0xc6   :  { %1212 = vmatmul.mubr.msk.f32.gmra.mrb[6].mxu0 %vm121_vm0, %v108_v12 }
  0xc7   :  { %258 = vmatprep.mubr.f32.mxu0 %v1383_v0 }
  0xc9   :  { %v109_v14 = vpop.trf.xlu0  ;;  %v661_v18 = vpop.trf.xlu1 }
  0xca   :  { %1213 = vmatmul.mubr.msk.f32.gmra.mrb[8].mxu0 %vm121_vm0, %v109_v14  ;;  %v1597_v14 = vld [vmem:[#allocation7 + $0x10] sm:$0xff] }
  0xcb   :  { %264 = vmatprep.mubr.f32.mxu0 %v1383_v0 }
  0xcd   :  { %v110_v16 = vpop.trf.xlu0  ;;  %v662_v20 = vpop.trf.xlu1 }
  0xce   :  { %1214 = vmatmul.mubr.msk.f32.gmra.mrb[10].mxu0 %vm121_vm0, %v110_v16 }
  0xcf   :  { %270 = vmatprep.mubr.f32.mxu0 %v1383_v0 }
  0xd1   :  { %v111_v17 = vpop.trf.xlu0  ;;  %v663_v23 = vpop.trf.xlu1 }
  0xd2   :  { %1215 = vmatmul.mubr.msk.f32.gmra.mrb[12].mxu0 %vm121_vm0, %v111_v17 }
  0xd3   :  { %276 = vmatprep.mubr.f32.mxu0 %v1383_v0 }
  0xd5   :  { %v112_v19 = vpop.trf.xlu0  ;;  %v664_v25 = vpop.trf.xlu1 }
  0xd6   :  { %1216 = vmatmul.mubr.msk.f32.gmra.mrb[14].mxu0 %vm121_vm0, %v112_v19  ;;  %v1603_v19 = vld [vmem:[#allocation7 + $0x20] sm:$0xff] }
  0xd7   :  { %282 = vmatprep.mubr.f32.mxu0 %v1383_v0 }
  0xd9   :  { %v113_v21 = vpop.trf.xlu0  ;;  %v1482_v28 = vpop.trf.xlu1 }
  0xda   :  { %1217 = vmatmul.mubr.msk.f32.gmra.mrb[16].mxu0 %vm121_vm0, %v113_v21 }
  0xdb   :  { %288 = vmatprep.mubr.f32.mxu0 %v1383_v0 }
  0xdd   :  { %v114_v22 = vpop.trf.xlu0  ;;  %v666_v30 = vpop.trf.xlu1 }
  0xde   :  { %1218 = vmatmul.mubr.msk.f32.gmra.mrb[18].mxu0 %vm121_vm0, %v114_v22 }
  0xdf   :  { %294 = vmatprep.mubr.f32.mxu0 %v1383_v0 }
  0xe1   :  { %v115_v24 = vpop.trf.xlu0  ;;  %v1490_v33 = vpop.trf.xlu1 }
  0xe2   :  { %1219 = vmatmul.mubr.msk.f32.gmra.mrb[20].mxu0 %vm121_vm0, %v115_v24 }
  0xe3   :  { %300 = vmatprep.mubr.f32.mxu0 %v1383_v0 }
  0xe5   :  { %v116_v26 = vpop.trf.xlu0  ;;  %v668_v35 = vpop.trf.xlu1 }
  0xe6   :  { %1220 = vmatmul.mubr.msk.f32.gmra.mrb[22].mxu0 %vm121_vm0, %v116_v26  ;;  %v1611_v26 = vld [vmem:[#allocation7 + $0x38] sm:$0xff] }
  0xe7   :  { %306 = vmatprep.mubr.f32.mxu0 %v1383_v0 }
  0xe9   :  { %v117_v27 = vpop.trf.xlu0  ;;  %v669_v38 = vpop.trf.xlu1 }
  0xea   :  { %1221 = vmatmul.mubr.msk.f32.gmra.mrb[24].mxu0 %vm121_vm0, %v117_v27 }
  0xeb   :  { %312 = vmatprep.mubr.f32.mxu0 %v1383_v0 }
  0xed   :  { %v118_v29 = vpop.trf.xlu0  ;;  %v670_v40 = vpop.trf.xlu1 }
  0xee   :  { %1222 = vmatmul.mubr.msk.f32.gmra.mrb[26].mxu0 %vm121_vm0, %v118_v29 }
  0xef   :  { %318 = vmatprep.mubr.f32.mxu0 %v1383_v0 }
  0xf1   :  { %v119_v31 = vpop.trf.xlu0  ;;  %v671_v43 = vpop.trf.xlu1 }
  0xf2   :  { %1223 = vmatmul.mubr.msk.f32.gmra.mrb[28].mxu0 %vm121_vm0, %v119_v31  ;;  %v1615_v31 = vld [vmem:[#allocation7 + $0x40] sm:$0xff] }
  0xf3   :  { %324 = vmatprep.mubr.f32.mxu0 %v1383_v0 }
  0xf5   :  { %v120_v32 = vpop.trf.xlu0  ;;  %v672_v45 = vpop.trf.xlu1 }
  0xf6   :  { %1224 = vmatmul.mubr.msk.f32.gmra.mrb[30].mxu0 %vm121_vm0, %v120_v32  ;;  %v1617_v32 = vld [vmem:[#allocation7 + $0x48] sm:$0xff] }
  0xf7   :  { %785 = vmatprep.mubr.f32.mxu0 %v1383_v0 }
  0xf9   :  { %v381_v34 = vpop.trf.xlu0  ;;  %v933_v48 = vpop.trf.xlu1 }
  0xfa   :  { %1225 = vmatmul.mubr.msk.f32.vlgmr.msra.gmra.mrb[0].mxu1 %vm121_vm0, %v381_v34  ;;  %1241 = vmatmul.mubr.msk.f32.vlgmr.msra.gmra.mrb[32].mxu0 %vm121_vm0, %v657_v8  ;;  %v1591_v8 = vld [vmem:[#allocation7] sm:$0xff] }
  0xfb   :  { %998 = vmatpush1.msra.mxu1 %v1453_v4  ;;  %515 = vmatprep.mubr.f32.mxu1 %v1383_v0 }
  0xfc   :  { %791 = vmatprep.mubr.f32.mxu0 %v1383_v0 }
  0xfd   :  { %v382_v36 = vpop.trf.xlu0  ;;  %v934_v50 = vpop.trf.xlu1 }
  0xfe   :  { %1226 = vmatmul.mubr.msk.f32.gmra.mrb[2].mxu1 %vm121_vm0, %v382_v36  ;;  %1242 = vmatmul.mubr.msk.f32.gmra.mrb[34].mxu0 %vm121_vm0, %v658_v10 }
  0xff   :  { %521 = vmatprep.mubr.f32.mxu1 %v1383_v0  ;;  %797 = vmatprep.mubr.f32.mxu0 %v1383_v0 }
 0x101   :  { %v383_v37 = vpop.trf.xlu0  ;;  %v935_v53 = vpop.trf.xlu1 }
 0x102   :  { %1227 = vmatmul.mubr.msk.f32.gmra.mrb[4].mxu1 %vm121_vm0, %v383_v37  ;;  %1243 = vmatmul.mubr.msk.f32.gmra.mrb[36].mxu0 %vm121_vm0, %v659_v13  ;;  %v1621_v37 = vld [vmem:[#allocation7 + $0x50] sm:$0xff] }
 0x103   :  { %527 = vmatprep.mubr.f32.mxu1 %v1383_v0  ;;  %803 = vmatprep.mubr.f32.mxu0 %v1383_v0 }
 0x105   :  { %v384_v39 = vpop.trf.xlu0  ;;  %v936_v55 = vpop.trf.xlu1 }
 0x106   :  { %1228 = vmatmul.mubr.msk.f32.gmra.mrb[6].mxu1 %vm121_vm0, %v384_v39  ;;  %1244 = vmatmul.mubr.msk.f32.gmra.mrb[38].mxu0 %vm121_vm0, %v660_v15  ;;  %v1599_v15 = vld [vmem:[#allocation7 + $0x18] sm:$0xff] }
 0x107   :  { %533 = vmatprep.mubr.f32.mxu1 %v1383_v0  ;;  %809 = vmatprep.mubr.f32.mxu0 %v1383_v0 }
 0x109   :  { %v385_v41 = vpop.trf.xlu0  ;;  %v937_v58 = vpop.trf.xlu1 }
 0x10a   :  { %1229 = vmatmul.mubr.msk.f32.gmra.mrb[8].mxu1 %vm121_vm0, %v385_v41  ;;  %1245 = vmatmul.mubr.msk.f32.gmra.mrb[40].mxu0 %vm121_vm0, %v661_v18 }
 0x10b   :  { %539 = vmatprep.mubr.f32.mxu1 %v1383_v0  ;;  %815 = vmatprep.mubr.f32.mxu0 %v1383_v0 }
 0x10d   :  { %v386_v42 = vpop.trf.xlu0  ;;  %v938_v60 = vpop.trf.xlu1 }
 0x10e   :  { %1230 = vmatmul.mubr.msk.f32.gmra.mrb[10].mxu1 %vm121_vm0, %v386_v42  ;;  %1246 = vmatmul.mubr.msk.f32.gmra.mrb[42].mxu0 %vm121_vm0, %v662_v20  ;;  %v1605_v20 = vld [vmem:[#allocation7 + $0x28] sm:$0xff] }
 0x10f   :  { %545 = vmatprep.mubr.f32.mxu1 %v1383_v0  ;;  %821 = vmatprep.mubr.f32.mxu0 %v1383_v0 }
 0x111   :  { %v387_v44 = vpop.trf.xlu0  ;;  %v939_v61 = vpop.trf.xlu1 }
 0x112   :  { %1231 = vmatmul.mubr.msk.f32.gmra.mrb[12].mxu1 %vm121_vm0, %v387_v44  ;;  %1247 = vmatmul.mubr.msk.f32.gmra.mrb[44].mxu0 %vm121_vm0, %v663_v23  ;;  %v1629_v44 = vld [vmem:[#allocation7 + $0x68] sm:$0xff] }
 0x113   :  { %551 = vmatprep.mubr.f32.mxu1 %v1383_v0  ;;  %827 = vmatprep.mubr.f32.mxu0 %v1383_v0 }
 0x115   :  { %v388_v46 = vpop.trf.xlu0  ;;  %v940_v62 = vpop.trf.xlu1 }
 0x116   :  { %1232 = vmatmul.mubr.msk.f32.gmra.mrb[14].mxu1 %vm121_vm0, %v388_v46  ;;  %1248 = vmatmul.mubr.msk.f32.gmra.mrb[46].mxu0 %vm121_vm0, %v664_v25  ;;  %v1609_v25 = vld [vmem:[#allocation7 + $0x30] sm:$0xff] }
 0x117   :  { %557 = vmatprep.mubr.f32.mxu1 %v1383_v0  ;;  %833 = vmatprep.mubr.f32.mxu0 %v1383_v0 }
 0x119   :  { %v389_v47 = vpop.trf.xlu0  ;;  %v941_v63 = vpop.trf.xlu1 }
 0x11a   :  { %1233 = vmatmul.mubr.msk.f32.gmra.mrb[16].mxu1 %vm121_vm0, %v389_v47  ;;  %1249 = vmatmul.mubr.msk.f32.gmra.mrb[48].mxu0 %vm121_vm0, %v1482_v28 }
 0x11b   :  { %563 = vmatprep.mubr.f32.mxu1 %v1383_v0  ;;  %839 = vmatprep.mubr.f32.mxu0 %v1383_v0 }
 0x11d   :  { %v390_v49 = vpop.trf.xlu0  ;;  %v942_v1 = vpop.trf.xlu1 }
 0x11e   :  { %1234 = vmatmul.mubr.msk.f32.gmra.mrb[18].mxu1 %vm121_vm0, %v390_v49  ;;  %1250 = vmatmul.mubr.msk.f32.gmra.mrb[50].mxu0 %vm121_vm0, %v666_v30  ;;  %v1633_v49 = vld [vmem:[#allocation7 + $0x70] sm:$0xff] }
 0x11f   :  { %569 = vmatprep.mubr.f32.mxu1 %v1383_v0  ;;  %845 = vmatprep.mubr.f32.mxu0 %v1383_v0 }
 0x121   :  { %v391_v51 = vpop.trf.xlu0  ;;  %v943_v2 = vpop.trf.xlu1 }
 0x122   :  { %1235 = vmatmul.mubr.msk.f32.gmra.mrb[20].mxu1 %vm121_vm0, %v391_v51  ;;  %1251 = vmatmul.mubr.msk.f32.gmra.mrb[52].mxu0 %vm121_vm0, %v1490_v33 }
 0x123   :  { %575 = vmatprep.mubr.f32.mxu1 %v1383_v0  ;;  %851 = vmatprep.mubr.f32.mxu0 %v1383_v0 }
 0x125   :  { %v392_v52 = vpop.trf.xlu0  ;;  %v944_v3 = vpop.trf.xlu1 }
 0x126   :  { %1236 = vmatmul.mubr.msk.f32.gmra.mrb[22].mxu1 %vm121_vm0, %v392_v52  ;;  %1252 = vmatmul.mubr.msk.f32.gmra.mrb[54].mxu0 %vm121_vm0, %v668_v35 }
 0x127   :  { %581 = vmatprep.mubr.f32.mxu1 %v1383_v0  ;;  %857 = vmatprep.mubr.f32.mxu0 %v1383_v0 }
 0x129   :  { %v393_v54 = vpop.trf.xlu0  ;;  %v945_v4 = vpop.trf.xlu1 }
 0x12a   :  { %1237 = vmatmul.mubr.msk.f32.gmra.mrb[24].mxu1 %vm121_vm0, %v393_v54  ;;  %1253 = vmatmul.mubr.msk.f32.gmra.mrb[56].mxu0 %vm121_vm0, %v669_v38  ;;  %v1623_v38 = vld [vmem:[#allocation7 + $0x58] sm:$0xff] }
 0x12b   :  { %587 = vmatprep.mubr.f32.mxu1 %v1383_v0  ;;  %863 = vmatprep.mubr.f32.mxu0 %v1383_v0 }
 0x12d   :  { %v394_v56 = vpop.trf.xlu0  ;;  %v946_v5 = vpop.trf.xlu1 }
 0x12e   :  { %1238 = vmatmul.mubr.msk.f32.gmra.mrb[26].mxu1 %vm121_vm0, %v394_v56  ;;  %1254 = vmatmul.mubr.msk.f32.gmra.mrb[58].mxu0 %vm121_vm0, %v670_v40  ;;  %v1641_v56 = vld [vmem:[#allocation7 + $0x88] sm:$0xff] }
 0x12f   :  { %593 = vmatprep.mubr.f32.mxu1 %v1383_v0  ;;  %869 = vmatprep.mubr.f32.mxu0 %v1383_v0 }
 0x131   :  { %v395_v57 = vpop.trf.xlu0  ;;  %v947_v6 = vpop.trf.xlu1 }
 0x132   :  { %1239 = vmatmul.mubr.msk.f32.gmra.mrb[28].mxu1 %vm121_vm0, %v395_v57  ;;  %1255 = vmatmul.mubr.msk.f32.gmra.mrb[60].mxu0 %vm121_vm0, %v671_v43  ;;  %v1627_v43 = vld [vmem:[#allocation7 + $0x60] sm:$0xff] }
 0x133   :  { %599 = vmatprep.mubr.f32.mxu1 %v1383_v0  ;;  %875 = vmatprep.mubr.f32.mxu0 %v1383_v0 }
 0x135   :  { %v396_v59 = vpop.trf.xlu0  ;;  %v948_v7 = vpop.trf.xlu1 }
 0x136   :  { %1240 = vmatmul.mubr.msk.f32.gmra.mrb[30].mxu1 %vm121_vm0, %v396_v59  ;;  %1256 = vmatmul.mubr.msk.f32.gmra.mrb[62].mxu0 %vm121_vm0, %v672_v45 }
 0x137   :  { %1061 = vmatprep.mubr.f32.mxu1 %v1383_v0 }
 0x13a   :  { %1257 = vmatmul.mubr.msk.f32.vlgmr.msra.gmra.mrb[32].mxu1 %vm121_vm0, %v933_v48 }
 0x13b   :  { %1067 = vmatprep.mubr.f32.mxu1 %v1383_v0 }
 0x13e   :  { %1258 = vmatmul.mubr.msk.f32.gmra.mrb[34].mxu1 %vm121_vm0, %v934_v50  ;;  %v1635_v50 = vld [vmem:[#allocation7 + $0x78] sm:$0xff] }
 0x13f   :  { %1073 = vmatprep.mubr.f32.mxu1 %v1383_v0 }
 0x142   :  { %1259 = vmatmul.mubr.msk.f32.gmra.mrb[36].mxu1 %vm121_vm0, %v935_v53 }
 0x143   :  { %1079 = vmatprep.mubr.f32.mxu1 %v1383_v0 }
 0x146   :  { %1260 = vmatmul.mubr.msk.f32.gmra.mrb[38].mxu1 %vm121_vm0, %v936_v55  ;;  %v1639_v55 = vld [vmem:[#allocation7 + $0x80] sm:$0xff] }
 0x147   :  { %1085 = vmatprep.mubr.f32.mxu1 %v1383_v0 }
 0x14a   :  { %1261 = vmatmul.mubr.msk.f32.gmra.mrb[40].mxu1 %vm121_vm0, %v937_v58 }
 0x14b   :  { %1091 = vmatprep.mubr.f32.mxu1 %v1383_v0 }
 0x14e   :  { %1262 = vmatmul.mubr.msk.f32.gmra.mrb[42].mxu1 %vm121_vm0, %v938_v60 }
 0x14f   :  { %1097 = vmatprep.mubr.f32.mxu1 %v1383_v0 }
 0x152   :  { %1263 = vmatmul.mubr.msk.f32.gmra.mrb[44].mxu1 %vm121_vm0, %v939_v61  ;;  %v1645_v61 = vld [vmem:[#allocation7 + $0x90] sm:$0xff] }
 0x153   :  { %1103 = vmatprep.mubr.f32.mxu1 %v1383_v0 }
 0x156   :  { %1264 = vmatmul.mubr.msk.f32.gmra.mrb[46].mxu1 %vm121_vm0, %v940_v62  ;;  %v1647_v62 = vld [vmem:[#allocation7 + $0x98] sm:$0xff] }
 0x157   :  { %1109 = vmatprep.mubr.f32.mxu1 %v1383_v0 }
 0x15a   :  { %1265 = vmatmul.mubr.msk.f32.gmra.mrb[48].mxu1 %vm121_vm0, %v941_v63 }
 0x15b   :  { %1115 = vmatprep.mubr.f32.mxu1 %v1383_v0 }
 0x15e   :  { %1266 = vmatmul.mubr.msk.f32.gmra.mrb[50].mxu1 %vm121_vm0, %v942_v1 }
 0x15f   :  { %1121 = vmatprep.mubr.f32.mxu1 %v1383_v0 }
 0x162   :  { %1267 = vmatmul.mubr.msk.f32.gmra.mrb[52].mxu1 %vm121_vm0, %v943_v2 }
 0x163   :  { %1127 = vmatprep.mubr.f32.mxu1 %v1383_v0 }
 0x166   :  { %1268 = vmatmul.mubr.msk.f32.gmra.mrb[54].mxu1 %vm121_vm0, %v944_v3 }
 0x167   :  { %1133 = vmatprep.mubr.f32.mxu1 %v1383_v0 }
 0x16a   :  { %1269 = vmatmul.mubr.msk.f32.gmra.mrb[56].mxu1 %vm121_vm0, %v945_v4  ;;  %v1651_v4 = vld [vmem:[#allocation7 + $0xa0] sm:$0xff] }
 0x16b   :  { %1139 = vmatprep.mubr.f32.mxu1 %v1383_v0 }
 0x16e   :  { %1270 = vmatmul.mubr.msk.f32.gmra.mrb[58].mxu1 %vm121_vm0, %v946_v5  ;;  %v1653_v5 = vld [vmem:[#allocation7 + $0xa8] sm:$0xff] }
 0x16f   :  { %1145 = vmatprep.mubr.f32.mxu1 %v1383_v0 }
 0x172   :  { %1271 = vmatmul.mubr.msk.f32.gmra.mrb[60].mxu1 %vm121_vm0, %v947_v6 }
 0x173   :  { %1151 = vmatprep.mubr.f32.mxu1 %v1383_v0 }
 0x176   :  { %1272 = vmatmul.mubr.msk.f32.gmra.mrb[62].mxu1 %vm121_vm0, %v948_v7 }
 0x18d   :  { %v236_v10 = vpop.f32.mrb[0].mxu0 }
 0x18e   :  { %v237_v11 = vadd.f32 %v236_v10, %v1591_v8  ;;  %v238_v12 = vpop.f32.mrb[1].mxu0 }
 0x18f   :  { %v239_v13 = vadd.f32 %v238_v12, %v1593_v9  ;;  %v1657_v12 = vld [vmem:[#allocation7 + $0xb0] sm:$0xff] }
 0x190   :  { %331 = vst [vmem:[#allocation8] sm:$0xff] %v237_v11 }
 0x191   :  { %332 = vst [vmem:[#allocation8 + $0x8] sm:$0xff] %v239_v13  ;;  %v242_v16 = vpop.f32.mrb[2].mxu0  ;;  %v1659_v13 = vld [vmem:[#allocation7 + $0xb8] sm:$0xff] }
 0x192   :  { %v243_v0 = vadd.f32 %v242_v16, %v1597_v14  ;;  %v244_v17 = vpop.f32.mrb[3].mxu0 }
 0x193   :  { %v245_v18 = vadd.f32 %v244_v17, %v1599_v15 }
 0x194   :  { %333 = vst [vmem:[#allocation8 + $0x10] sm:$0xff] %v243_v0 }
 0x195   :  { %334 = vst [vmem:[#allocation8 + $0x18] sm:$0xff] %v245_v18  ;;  %v248_v21 = vpop.f32.mrb[4].mxu0 }
 0x196   :  { %v249_v22 = vadd.f32 %v248_v21, %v1603_v19  ;;  %v250_v23 = vpop.f32.mrb[5].mxu0  ;;  %v1663_v21 = vld [vmem:[#allocation7 + $0xc0] sm:$0xff] }
 0x197   :  { %v251_v24 = vadd.f32 %v250_v23, %v1605_v20 }
 0x198   :  { %335 = vst [vmem:[#allocation8 + $0x20] sm:$0xff] %v249_v22  ;;  %v1665_v22 = vld [vmem:[#allocation7 + $0xc8] sm:$0xff] }
 0x199   :  { %336 = vst [vmem:[#allocation8 + $0x28] sm:$0xff] %v251_v24  ;;  %v254_v27 = vpop.f32.mrb[6].mxu0 }
 0x19a   :  { %v255_v28 = vadd.f32 %v254_v27, %v1609_v25  ;;  %v256_v29 = vpop.f32.mrb[7].mxu0 }
 0x19b   :  { %v257_v30 = vadd.f32 %v256_v29, %v1611_v26  ;;  %v1669_v29 = vld [vmem:[#allocation7 + $0xd0] sm:$0xff] }
 0x19c   :  { %337 = vst [vmem:[#allocation8 + $0x30] sm:$0xff] %v255_v28 }
 0x19d   :  { %338 = vst [vmem:[#allocation8 + $0x38] sm:$0xff] %v257_v30  ;;  %v260_v33 = vpop.f32.mrb[8].mxu0  ;;  %v1671_v30 = vld [vmem:[#allocation7 + $0xd8] sm:$0xff] }
 0x19e   :  { %v261_v34 = vadd.f32 %v260_v33, %v1615_v31  ;;  %v262_v35 = vpop.f32.mrb[9].mxu0 }
 0x19f   :  { %v263_v36 = vadd.f32 %v262_v35, %v1617_v32 }
 0x1a0   :  { %339 = vst [vmem:[#allocation8 + $0x40] sm:$0xff] %v261_v34 }
 0x1a1   :  { %340 = vst [vmem:[#allocation8 + $0x48] sm:$0xff] %v263_v36  ;;  %v266_v39 = vpop.f32.mrb[10].mxu0 }
 0x1a2   :  { %v267_v40 = vadd.f32 %v266_v39, %v1621_v37  ;;  %v268_v41 = vpop.f32.mrb[11].mxu0  ;;  %v1675_v39 = vld [vmem:[#allocation7 + $0xe0] sm:$0xff] }
 0x1a3   :  { %v269_v42 = vadd.f32 %v268_v41, %v1623_v38 }
 0x1a4   :  { %341 = vst [vmem:[#allocation8 + $0x50] sm:$0xff] %v267_v40  ;;  %v1677_v40 = vld [vmem:[#allocation7 + $0xe8] sm:$0xff] }
 0x1a5   :  { %342 = vst [vmem:[#allocation8 + $0x58] sm:$0xff] %v269_v42  ;;  %v272_v45 = vpop.f32.mrb[12].mxu0 }
 0x1a6   :  { %v273_v46 = vadd.f32 %v272_v45, %v1627_v43  ;;  %v274_v47 = vpop.f32.mrb[13].mxu0 }
 0x1a7   :  { %v275_v48 = vadd.f32 %v274_v47, %v1629_v44  ;;  %v1681_v47 = vld [vmem:[#allocation7 + $0xf0] sm:$0xff] }
 0x1a8   :  { %343 = vst [vmem:[#allocation8 + $0x60] sm:$0xff] %v273_v46 }
 0x1a9   :  { %344 = vst [vmem:[#allocation8 + $0x68] sm:$0xff] %v275_v48  ;;  %v278_v51 = vpop.f32.mrb[14].mxu0  ;;  %v1683_v48 = vld [vmem:[#allocation7 + $0xf8] sm:$0xff] }
 0x1aa   :  { %v279_v52 = vadd.f32 %v278_v51, %v1633_v49  ;;  %v280_v53 = vpop.f32.mrb[15].mxu0 }
 0x1ab   :  { %v281_v54 = vadd.f32 %v280_v53, %v1635_v50 }
 0x1ac   :  { %345 = vst [vmem:[#allocation8 + $0x70] sm:$0xff] %v279_v52 }
 0x1ad   :  { %346 = vst [vmem:[#allocation8 + $0x78] sm:$0xff] %v281_v54  ;;  %v284_v57 = vpop.f32.mrb[16].mxu0 }
 0x1ae   :  { %v285_v58 = vadd.f32 %v284_v57, %v1639_v55  ;;  %v286_v59 = vpop.f32.mrb[17].mxu0 }
 0x1af   :  { %v287_v60 = vadd.f32 %v286_v59, %v1641_v56 }
 0x1b0   :  { %347 = vst [vmem:[#allocation8 + $0x80] sm:$0xff] %v285_v58 }
 0x1b1   :  { %348 = vst [vmem:[#allocation8 + $0x88] sm:$0xff] %v287_v60  ;;  %v290_v63 = vpop.f32.mrb[18].mxu0 }
 0x1b2   :  { %v291_v1 = vadd.f32 %v290_v63, %v1645_v61  ;;  %v292_v2 = vpop.f32.mrb[19].mxu0 }
 0x1b3   :  { %v293_v3 = vadd.f32 %v292_v2, %v1647_v62 }
 0x1b4   :  { %349 = vst [vmem:[#allocation8 + $0x90] sm:$0xff] %v291_v1 }
 0x1b5   :  { %350 = vst [vmem:[#allocation8 + $0x98] sm:$0xff] %v293_v3  ;;  %v296_v6 = vpop.f32.mrb[20].mxu0 }
 0x1b6   :  { %v297_v7 = vadd.f32 %v296_v6, %v1651_v4  ;;  %v298_v10 = vpop.f32.mrb[21].mxu0 }
 0x1b7   :  { %v299_v11 = vadd.f32 %v298_v10, %v1653_v5 }
 0x1b8   :  { %351 = vst [vmem:[#allocation8 + $0xa0] sm:$0xff] %v297_v7 }
 0x1b9   :  { %352 = vst [vmem:[#allocation8 + $0xa8] sm:$0xff] %v299_v11  ;;  %v302_v16 = vpop.f32.mrb[22].mxu0 }
 0x1ba   :  { %v303_v0 = vadd.f32 %v302_v16, %v1657_v12  ;;  %v304_v17 = vpop.f32.mrb[23].mxu0 }
 0x1bb   :  { %v305_v18 = vadd.f32 %v304_v17, %v1659_v13 }
 0x1bc   :  { %353 = vst [vmem:[#allocation8 + $0xb0] sm:$0xff] %v303_v0 }
 0x1bd   :  { %354 = vst [vmem:[#allocation8 + $0xb8] sm:$0xff] %v305_v18  ;;  %v308_v23 = vpop.f32.mrb[24].mxu0 }
 0x1be   :  { %v309_v24 = vadd.f32 %v308_v23, %v1663_v21  ;;  %v310_v27 = vpop.f32.mrb[25].mxu0 }
 0x1bf   :  { %v311_v28 = vadd.f32 %v310_v27, %v1665_v22 }
 0x1c0   :  { %355 = vst [vmem:[#allocation8 + $0xc0] sm:$0xff] %v309_v24 }
 0x1c1   :  { %356 = vst [vmem:[#allocation8 + $0xc8] sm:$0xff] %v311_v28  ;;  %v314_v33 = vpop.f32.mrb[26].mxu0 }
 0x1c2   :  { %v315_v34 = vadd.f32 %v314_v33, %v1669_v29  ;;  %v316_v35 = vpop.f32.mrb[27].mxu0 }
 0x1c3   :  { %v317_v36 = vadd.f32 %v316_v35, %v1671_v30 }
 0x1c4   :  { %357 = vst [vmem:[#allocation8 + $0xd0] sm:$0xff] %v315_v34 }
 0x1c5   :  { %358 = vst [vmem:[#allocation8 + $0xd8] sm:$0xff] %v317_v36  ;;  %v320_v41 = vpop.f32.mrb[28].mxu0 }
 0x1c6   :  { %v321_v42 = vadd.f32 %v320_v41, %v1675_v39  ;;  %v322_v45 = vpop.f32.mrb[29].mxu0 }
 0x1c7   :  { %v323_v46 = vadd.f32 %v322_v45, %v1677_v40 }
 0x1c8   :  { %359 = vst [vmem:[#allocation8 + $0xe0] sm:$0xff] %v321_v42 }
 0x1c9   :  { %360 = vst [vmem:[#allocation8 + $0xe8] sm:$0xff] %v323_v46  ;;  %v326_v51 = vpop.f32.mrb[30].mxu0 }
 0x1ca   :  { %v327_v52 = vadd.f32 %v326_v51, %v1681_v47  ;;  %v328_v53 = vpop.f32.mrb[31].mxu0 }
 0x1cb   :  { %v329_v54 = vadd.f32 %v328_v53, %v1683_v48 }
 0x1cc   :  { %361 = vst [vmem:[#allocation8 + $0xf0] sm:$0xff] %v327_v52 }
 0x1cd   :  { %362 = vst [vmem:[#allocation8 + $0xf8] sm:$0xff] %v329_v54  ;;  %v511_v57 = vpop.f32.mrb[0].mxu1  ;;  %v787_v58 = vpop.f32.mrb[32].mxu0 }
 0x1ce   :  { %v512_v59 = vadd.f32 %v511_v57, %v1591_v8  ;;  %v788_v60 = vadd.f32 %v787_v58, %v1591_v8  ;;  %v513_v63 = vpop.f32.mrb[1].mxu1  ;;  %v789_v1 = vpop.f32.mrb[33].mxu0 }
 0x1cf   :  { %v514_v2 = vadd.f32 %v513_v63, %v1593_v9  ;;  %v790_v3 = vadd.f32 %v789_v1, %v1593_v9 }
 0x1d0   :  { %607 = vst [vmem:[#allocation8 + $0x100] sm:$0xff] %v512_v59  ;;  %883 = vst [vmem:[#allocation8 + $0x200] sm:$0xff] %v788_v60 }
 0x1d1   :  { %608 = vst [vmem:[#allocation8 + $0x108] sm:$0xff] %v514_v2  ;;  %884 = vst [vmem:[#allocation8 + $0x208] sm:$0xff] %v790_v3  ;;  %v517_v6 = vpop.f32.mrb[2].mxu1  ;;  %v793_v7 = vpop.f32.mrb[34].mxu0 }
 0x1d2   :  { %v518_v10 = vadd.f32 %v517_v6, %v1597_v14  ;;  %v794_v11 = vadd.f32 %v793_v7, %v1597_v14  ;;  %v519_v16 = vpop.f32.mrb[3].mxu1  ;;  %v795_v0 = vpop.f32.mrb[35].mxu0 }
 0x1d3   :  { %v520_v17 = vadd.f32 %v519_v16, %v1599_v15  ;;  %v796_v18 = vadd.f32 %v795_v0, %v1599_v15 }
 0x1d4   :  { %609 = vst [vmem:[#allocation8 + $0x110] sm:$0xff] %v518_v10  ;;  %885 = vst [vmem:[#allocation8 + $0x210] sm:$0xff] %v794_v11 }
 0x1d5   :  { %610 = vst [vmem:[#allocation8 + $0x118] sm:$0xff] %v520_v17  ;;  %886 = vst [vmem:[#allocation8 + $0x218] sm:$0xff] %v796_v18  ;;  %v523_v23 = vpop.f32.mrb[4].mxu1  ;;  %v799_v24 = vpop.f32.mrb[36].mxu0 }
 0x1d6   :  { %v524_v27 = vadd.f32 %v523_v23, %v1603_v19  ;;  %v800_v28 = vadd.f32 %v799_v24, %v1603_v19  ;;  %v525_v33 = vpop.f32.mrb[5].mxu1  ;;  %v801_v34 = vpop.f32.mrb[37].mxu0 }
 0x1d7   :  { %v526_v35 = vadd.f32 %v525_v33, %v1605_v20  ;;  %v802_v36 = vadd.f32 %v801_v34, %v1605_v20 }
 0x1d8   :  { %611 = vst [vmem:[#allocation8 + $0x120] sm:$0xff] %v524_v27  ;;  %887 = vst [vmem:[#allocation8 + $0x220] sm:$0xff] %v800_v28 }
 0x1d9   :  { %612 = vst [vmem:[#allocation8 + $0x128] sm:$0xff] %v526_v35  ;;  %888 = vst [vmem:[#allocation8 + $0x228] sm:$0xff] %v802_v36  ;;  %v529_v41 = vpop.f32.mrb[6].mxu1  ;;  %v805_v42 = vpop.f32.mrb[38].mxu0 }
 0x1da   :  { %v530_v45 = vadd.f32 %v529_v41, %v1609_v25  ;;  %v806_v46 = vadd.f32 %v805_v42, %v1609_v25  ;;  %v531_v51 = vpop.f32.mrb[7].mxu1  ;;  %v807_v52 = vpop.f32.mrb[39].mxu0 }
 0x1db   :  { %v532_v53 = vadd.f32 %v531_v51, %v1611_v26  ;;  %v808_v54 = vadd.f32 %v807_v52, %v1611_v26 }
 0x1dc   :  { %613 = vst [vmem:[#allocation8 + $0x130] sm:$0xff] %v530_v45  ;;  %889 = vst [vmem:[#allocation8 + $0x230] sm:$0xff] %v806_v46 }
 0x1dd   :  { %614 = vst [vmem:[#allocation8 + $0x138] sm:$0xff] %v532_v53  ;;  %890 = vst [vmem:[#allocation8 + $0x238] sm:$0xff] %v808_v54  ;;  %v535_v57 = vpop.f32.mrb[8].mxu1  ;;  %v811_v58 = vpop.f32.mrb[40].mxu0 }
 0x1de   :  { %v536_v59 = vadd.f32 %v535_v57, %v1615_v31  ;;  %v812_v60 = vadd.f32 %v811_v58, %v1615_v31  ;;  %v537_v63 = vpop.f32.mrb[9].mxu1  ;;  %v813_v1 = vpop.f32.mrb[41].mxu0 }
 0x1df   :  { %v538_v2 = vadd.f32 %v537_v63, %v1617_v32  ;;  %v814_v3 = vadd.f32 %v813_v1, %v1617_v32 }
 0x1e0   :  { %615 = vst [vmem:[#allocation8 + $0x140] sm:$0xff] %v536_v59  ;;  %891 = vst [vmem:[#allocation8 + $0x240] sm:$0xff] %v812_v60 }
 0x1e1   :  { %616 = vst [vmem:[#allocation8 + $0x148] sm:$0xff] %v538_v2  ;;  %892 = vst [vmem:[#allocation8 + $0x248] sm:$0xff] %v814_v3  ;;  %v541_v6 = vpop.f32.mrb[10].mxu1  ;;  %v817_v7 = vpop.f32.mrb[42].mxu0 }
 0x1e2   :  { %v542_v10 = vadd.f32 %v541_v6, %v1621_v37  ;;  %v818_v11 = vadd.f32 %v817_v7, %v1621_v37  ;;  %v543_v16 = vpop.f32.mrb[11].mxu1  ;;  %v819_v0 = vpop.f32.mrb[43].mxu0 }
 0x1e3   :  { %v544_v17 = vadd.f32 %v543_v16, %v1623_v38  ;;  %v820_v18 = vadd.f32 %v819_v0, %v1623_v38 }
 0x1e4   :  { %617 = vst [vmem:[#allocation8 + $0x150] sm:$0xff] %v542_v10  ;;  %893 = vst [vmem:[#allocation8 + $0x250] sm:$0xff] %v818_v11 }
 0x1e5   :  { %618 = vst [vmem:[#allocation8 + $0x158] sm:$0xff] %v544_v17  ;;  %894 = vst [vmem:[#allocation8 + $0x258] sm:$0xff] %v820_v18  ;;  %v547_v23 = vpop.f32.mrb[12].mxu1  ;;  %v823_v24 = vpop.f32.mrb[44].mxu0 }
 0x1e6   :  { %v548_v27 = vadd.f32 %v547_v23, %v1627_v43  ;;  %v824_v28 = vadd.f32 %v823_v24, %v1627_v43  ;;  %v549_v33 = vpop.f32.mrb[13].mxu1  ;;  %v825_v34 = vpop.f32.mrb[45].mxu0 }
 0x1e7   :  { %v550_v35 = vadd.f32 %v549_v33, %v1629_v44  ;;  %v826_v36 = vadd.f32 %v825_v34, %v1629_v44 }
 0x1e8   :  { %619 = vst [vmem:[#allocation8 + $0x160] sm:$0xff] %v548_v27  ;;  %895 = vst [vmem:[#allocation8 + $0x260] sm:$0xff] %v824_v28 }
 0x1e9   :  { %620 = vst [vmem:[#allocation8 + $0x168] sm:$0xff] %v550_v35  ;;  %896 = vst [vmem:[#allocation8 + $0x268] sm:$0xff] %v826_v36  ;;  %v553_v41 = vpop.f32.mrb[14].mxu1  ;;  %v829_v42 = vpop.f32.mrb[46].mxu0 }
 0x1ea   :  { %v554_v45 = vadd.f32 %v553_v41, %v1633_v49  ;;  %v830_v46 = vadd.f32 %v829_v42, %v1633_v49  ;;  %v555_v51 = vpop.f32.mrb[15].mxu1  ;;  %v831_v52 = vpop.f32.mrb[47].mxu0 }
 0x1eb   :  { %v556_v53 = vadd.f32 %v555_v51, %v1635_v50  ;;  %v832_v54 = vadd.f32 %v831_v52, %v1635_v50 }
 0x1ec   :  { %621 = vst [vmem:[#allocation8 + $0x170] sm:$0xff] %v554_v45  ;;  %897 = vst [vmem:[#allocation8 + $0x270] sm:$0xff] %v830_v46 }
 0x1ed   :  { %622 = vst [vmem:[#allocation8 + $0x178] sm:$0xff] %v556_v53  ;;  %898 = vst [vmem:[#allocation8 + $0x278] sm:$0xff] %v832_v54  ;;  %v559_v57 = vpop.f32.mrb[16].mxu1  ;;  %v835_v58 = vpop.f32.mrb[48].mxu0 }
 0x1ee   :  { %v560_v59 = vadd.f32 %v559_v57, %v1639_v55  ;;  %v836_v60 = vadd.f32 %v835_v58, %v1639_v55  ;;  %v561_v63 = vpop.f32.mrb[17].mxu1  ;;  %v837_v1 = vpop.f32.mrb[49].mxu0 }
 0x1ef   :  { %v562_v2 = vadd.f32 %v561_v63, %v1641_v56  ;;  %v838_v3 = vadd.f32 %v837_v1, %v1641_v56 }
 0x1f0   :  { %623 = vst [vmem:[#allocation8 + $0x180] sm:$0xff] %v560_v59  ;;  %899 = vst [vmem:[#allocation8 + $0x280] sm:$0xff] %v836_v60 }
 0x1f1   :  { %624 = vst [vmem:[#allocation8 + $0x188] sm:$0xff] %v562_v2  ;;  %900 = vst [vmem:[#allocation8 + $0x288] sm:$0xff] %v838_v3  ;;  %v565_v6 = vpop.f32.mrb[18].mxu1  ;;  %v841_v7 = vpop.f32.mrb[50].mxu0 }
 0x1f2   :  { %v566_v10 = vadd.f32 %v565_v6, %v1645_v61  ;;  %v842_v11 = vadd.f32 %v841_v7, %v1645_v61  ;;  %v567_v16 = vpop.f32.mrb[19].mxu1  ;;  %v843_v0 = vpop.f32.mrb[51].mxu0 }
 0x1f3   :  { %v568_v17 = vadd.f32 %v567_v16, %v1647_v62  ;;  %v844_v18 = vadd.f32 %v843_v0, %v1647_v62 }
 0x1f4   :  { %625 = vst [vmem:[#allocation8 + $0x190] sm:$0xff] %v566_v10  ;;  %901 = vst [vmem:[#allocation8 + $0x290] sm:$0xff] %v842_v11 }
 0x1f5   :  { %626 = vst [vmem:[#allocation8 + $0x198] sm:$0xff] %v568_v17  ;;  %902 = vst [vmem:[#allocation8 + $0x298] sm:$0xff] %v844_v18  ;;  %v571_v23 = vpop.f32.mrb[20].mxu1  ;;  %v847_v24 = vpop.f32.mrb[52].mxu0 }
 0x1f6   :  { %v572_v27 = vadd.f32 %v571_v23, %v1651_v4  ;;  %v848_v28 = vadd.f32 %v847_v24, %v1651_v4  ;;  %v573_v33 = vpop.f32.mrb[21].mxu1  ;;  %v849_v34 = vpop.f32.mrb[53].mxu0 }
 0x1f7   :  { %v574_v35 = vadd.f32 %v573_v33, %v1653_v5  ;;  %v850_v36 = vadd.f32 %v849_v34, %v1653_v5 }
 0x1f8   :  { %627 = vst [vmem:[#allocation8 + $0x1a0] sm:$0xff] %v572_v27  ;;  %903 = vst [vmem:[#allocation8 + $0x2a0] sm:$0xff] %v848_v28 }
 0x1f9   :  { %628 = vst [vmem:[#allocation8 + $0x1a8] sm:$0xff] %v574_v35  ;;  %904 = vst [vmem:[#allocation8 + $0x2a8] sm:$0xff] %v850_v36  ;;  %v577_v41 = vpop.f32.mrb[22].mxu1  ;;  %v853_v42 = vpop.f32.mrb[54].mxu0 }
 0x1fa   :  { %v578_v45 = vadd.f32 %v577_v41, %v1657_v12  ;;  %v854_v46 = vadd.f32 %v853_v42, %v1657_v12  ;;  %v579_v51 = vpop.f32.mrb[23].mxu1  ;;  %v855_v52 = vpop.f32.mrb[55].mxu0 }
 0x1fb   :  { %v580_v53 = vadd.f32 %v579_v51, %v1659_v13  ;;  %v856_v54 = vadd.f32 %v855_v52, %v1659_v13 }
 0x1fc   :  { %629 = vst [vmem:[#allocation8 + $0x1b0] sm:$0xff] %v578_v45  ;;  %905 = vst [vmem:[#allocation8 + $0x2b0] sm:$0xff] %v854_v46 }
 0x1fd   :  { %630 = vst [vmem:[#allocation8 + $0x1b8] sm:$0xff] %v580_v53  ;;  %906 = vst [vmem:[#allocation8 + $0x2b8] sm:$0xff] %v856_v54  ;;  %v583_v57 = vpop.f32.mrb[24].mxu1  ;;  %v859_v58 = vpop.f32.mrb[56].mxu0 }
 0x1fe   :  { %v584_v59 = vadd.f32 %v583_v57, %v1663_v21  ;;  %v860_v60 = vadd.f32 %v859_v58, %v1663_v21  ;;  %v585_v63 = vpop.f32.mrb[25].mxu1  ;;  %v861_v1 = vpop.f32.mrb[57].mxu0 }
 0x1ff   :  { %v586_v2 = vadd.f32 %v585_v63, %v1665_v22  ;;  %v862_v3 = vadd.f32 %v861_v1, %v1665_v22 }
 0x200   :  { %631 = vst [vmem:[#allocation8 + $0x1c0] sm:$0xff] %v584_v59  ;;  %907 = vst [vmem:[#allocation8 + $0x2c0] sm:$0xff] %v860_v60 }
 0x201   :  { %632 = vst [vmem:[#allocation8 + $0x1c8] sm:$0xff] %v586_v2  ;;  %908 = vst [vmem:[#allocation8 + $0x2c8] sm:$0xff] %v862_v3  ;;  %v589_v6 = vpop.f32.mrb[26].mxu1  ;;  %v865_v7 = vpop.f32.mrb[58].mxu0 }
 0x202   :  { %v590_v10 = vadd.f32 %v589_v6, %v1669_v29  ;;  %v866_v11 = vadd.f32 %v865_v7, %v1669_v29  ;;  %v591_v16 = vpop.f32.mrb[27].mxu1  ;;  %v867_v0 = vpop.f32.mrb[59].mxu0 }
 0x203   :  { %v592_v17 = vadd.f32 %v591_v16, %v1671_v30  ;;  %v868_v18 = vadd.f32 %v867_v0, %v1671_v30 }
 0x204   :  { %633 = vst [vmem:[#allocation8 + $0x1d0] sm:$0xff] %v590_v10  ;;  %909 = vst [vmem:[#allocation8 + $0x2d0] sm:$0xff] %v866_v11 }
 0x205   :  { %634 = vst [vmem:[#allocation8 + $0x1d8] sm:$0xff] %v592_v17  ;;  %910 = vst [vmem:[#allocation8 + $0x2d8] sm:$0xff] %v868_v18  ;;  %v595_v23 = vpop.f32.mrb[28].mxu1  ;;  %v871_v24 = vpop.f32.mrb[60].mxu0 }
 0x206   :  { %v596_v27 = vadd.f32 %v595_v23, %v1675_v39  ;;  %v872_v28 = vadd.f32 %v871_v24, %v1675_v39  ;;  %v597_v33 = vpop.f32.mrb[29].mxu1  ;;  %v873_v34 = vpop.f32.mrb[61].mxu0 }
 0x207   :  { %v598_v35 = vadd.f32 %v597_v33, %v1677_v40  ;;  %v874_v36 = vadd.f32 %v873_v34, %v1677_v40 }
 0x208   :  { %635 = vst [vmem:[#allocation8 + $0x1e0] sm:$0xff] %v596_v27  ;;  %911 = vst [vmem:[#allocation8 + $0x2e0] sm:$0xff] %v872_v28 }
 0x209   :  { %636 = vst [vmem:[#allocation8 + $0x1e8] sm:$0xff] %v598_v35  ;;  %912 = vst [vmem:[#allocation8 + $0x2e8] sm:$0xff] %v874_v36  ;;  %v601_v41 = vpop.f32.mrb[30].mxu1  ;;  %v877_v42 = vpop.f32.mrb[62].mxu0 }
 0x20a   :  { %v602_v45 = vadd.f32 %v601_v41, %v1681_v47  ;;  %v878_v46 = vadd.f32 %v877_v42, %v1681_v47  ;;  %v603_v51 = vpop.f32.mrb[31].mxu1  ;;  %v879_v52 = vpop.f32.mrb[63].mxu0 }
 0x20b   :  { %v604_v53 = vadd.f32 %v603_v51, %v1683_v48  ;;  %v880_v54 = vadd.f32 %v879_v52, %v1683_v48 }
 0x20c   :  { %637 = vst [vmem:[#allocation8 + $0x1f0] sm:$0xff] %v602_v45  ;;  %913 = vst [vmem:[#allocation8 + $0x2f0] sm:$0xff] %v878_v46 }
 0x20d   :  { %638 = vst [vmem:[#allocation8 + $0x1f8] sm:$0xff] %v604_v53  ;;  %914 = vst [vmem:[#allocation8 + $0x2f8] sm:$0xff] %v880_v54  ;;  %v1063_v57 = vpop.f32.mrb[32].mxu1 }
 0x20e   :  { %v1064_v58 = vadd.f32 %v1063_v57, %v1591_v8  ;;  %v1065_v59 = vpop.f32.mrb[33].mxu1 }
 0x20f   :  { %v1066_v60 = vadd.f32 %v1065_v59, %v1593_v9 }
 0x210   :  { %1159 = vst [vmem:[#allocation8 + $0x300] sm:$0xff] %v1064_v58 }
 0x211   :  { %1160 = vst [vmem:[#allocation8 + $0x308] sm:$0xff] %v1066_v60  ;;  %v1069_v63 = vpop.f32.mrb[34].mxu1 }
 0x212   :  { %v1070_v1 = vadd.f32 %v1069_v63, %v1597_v14  ;;  %v1071_v2 = vpop.f32.mrb[35].mxu1 }
 0x213   :  { %v1072_v3 = vadd.f32 %v1071_v2, %v1599_v15 }
 0x214   :  { %1161 = vst [vmem:[#allocation8 + $0x310] sm:$0xff] %v1070_v1 }
 0x215   :  { %1162 = vst [vmem:[#allocation8 + $0x318] sm:$0xff] %v1072_v3  ;;  %v1075_v6 = vpop.f32.mrb[36].mxu1 }
 0x216   :  { %v1076_v7 = vadd.f32 %v1075_v6, %v1603_v19  ;;  %v1077_v10 = vpop.f32.mrb[37].mxu1 }
 0x217   :  { %v1078_v11 = vadd.f32 %v1077_v10, %v1605_v20 }
 0x218   :  { %1163 = vst [vmem:[#allocation8 + $0x320] sm:$0xff] %v1076_v7 }
 0x219   :  { %1164 = vst [vmem:[#allocation8 + $0x328] sm:$0xff] %v1078_v11  ;;  %v1081_v8 = vpop.f32.mrb[38].mxu1 }
 0x21a   :  { %v1082_v9 = vadd.f32 %v1081_v8, %v1609_v25  ;;  %v1083_v16 = vpop.f32.mrb[39].mxu1 }
 0x21b   :  { %v1084_v0 = vadd.f32 %v1083_v16, %v1611_v26 }
 0x21c   :  { %1165 = vst [vmem:[#allocation8 + $0x330] sm:$0xff] %v1082_v9 }
 0x21d   :  { %1166 = vst [vmem:[#allocation8 + $0x338] sm:$0xff] %v1084_v0  ;;  %v1087_v14 = vpop.f32.mrb[40].mxu1 }
 0x21e   :  { %v1088_v15 = vadd.f32 %v1087_v14, %v1615_v31  ;;  %v1089_v17 = vpop.f32.mrb[41].mxu1 }
 0x21f   :  { %v1090_v18 = vadd.f32 %v1089_v17, %v1617_v32 }
 0x220   :  { %1167 = vst [vmem:[#allocation8 + $0x340] sm:$0xff] %v1088_v15 }
 0x221   :  { %1168 = vst [vmem:[#allocation8 + $0x348] sm:$0xff] %v1090_v18  ;;  %v1093_v19 = vpop.f32.mrb[42].mxu1 }
 0x222   :  { %v1094_v20 = vadd.f32 %v1093_v19, %v1621_v37  ;;  %v1095_v23 = vpop.f32.mrb[43].mxu1 }
 0x223   :  { %v1096_v24 = vadd.f32 %v1095_v23, %v1623_v38 }
 0x224   :  { %1169 = vst [vmem:[#allocation8 + $0x350] sm:$0xff] %v1094_v20 }
 0x225   :  { %1170 = vst [vmem:[#allocation8 + $0x358] sm:$0xff] %v1096_v24  ;;  %v1099_v25 = vpop.f32.mrb[44].mxu1 }
 0x226   :  { %v1100_v26 = vadd.f32 %v1099_v25, %v1627_v43  ;;  %v1101_v27 = vpop.f32.mrb[45].mxu1 }
 0x227   :  { %v1102_v28 = vadd.f32 %v1101_v27, %v1629_v44 }
 0x228   :  { %1171 = vst [vmem:[#allocation8 + $0x360] sm:$0xff] %v1100_v26 }
 0x229   :  { %1172 = vst [vmem:[#allocation8 + $0x368] sm:$0xff] %v1102_v28  ;;  %v1105_v31 = vpop.f32.mrb[46].mxu1 }
 0x22a   :  { %v1106_v32 = vadd.f32 %v1105_v31, %v1633_v49  ;;  %v1107_v33 = vpop.f32.mrb[47].mxu1 }
 0x22b   :  { %v1108_v34 = vadd.f32 %v1107_v33, %v1635_v50 }
 0x22c   :  { %1173 = vst [vmem:[#allocation8 + $0x370] sm:$0xff] %v1106_v32 }
 0x22d   :  { %1174 = vst [vmem:[#allocation8 + $0x378] sm:$0xff] %v1108_v34  ;;  %v1111_v37 = vpop.f32.mrb[48].mxu1 }
 0x22e   :  { %v1112_v38 = vadd.f32 %v1111_v37, %v1639_v55  ;;  %v1113_v35 = vpop.f32.mrb[49].mxu1 }
 0x22f   :  { %v1114_v36 = vadd.f32 %v1113_v35, %v1641_v56 }
 0x230   :  { %1175 = vst [vmem:[#allocation8 + $0x380] sm:$0xff] %v1112_v38 }
 0x231   :  { %1176 = vst [vmem:[#allocation8 + $0x388] sm:$0xff] %v1114_v36  ;;  %v1117_v43 = vpop.f32.mrb[50].mxu1 }
 0x232   :  { %v1118_v44 = vadd.f32 %v1117_v43, %v1645_v61  ;;  %v1119_v41 = vpop.f32.mrb[51].mxu1 }
 0x233   :  { %v1120_v42 = vadd.f32 %v1119_v41, %v1647_v62 }
 0x234   :  { %1177 = vst [vmem:[#allocation8 + $0x390] sm:$0xff] %v1118_v44 }
 0x235   :  { %1178 = vst [vmem:[#allocation8 + $0x398] sm:$0xff] %v1120_v42  ;;  %v1123_v49 = vpop.f32.mrb[52].mxu1 }
 0x236   :  { %v1124_v50 = vadd.f32 %v1123_v49, %v1651_v4  ;;  %v1125_v45 = vpop.f32.mrb[53].mxu1 }
 0x237   :  { %v1126_v46 = vadd.f32 %v1125_v45, %v1653_v5 }
 0x238   :  { %1179 = vst [vmem:[#allocation8 + $0x3a0] sm:$0xff] %v1124_v50 }
 0x239   :  { %1180 = vst [vmem:[#allocation8 + $0x3a8] sm:$0xff] %v1126_v46  ;;  %v1129_v55 = vpop.f32.mrb[54].mxu1 }
 0x23a   :  { %v1130_v56 = vadd.f32 %v1129_v55, %v1657_v12  ;;  %v1131_v51 = vpop.f32.mrb[55].mxu1 }
 0x23b   :  { %v1132_v52 = vadd.f32 %v1131_v51, %v1659_v13 }
 0x23c   :  { %1181 = vst [vmem:[#allocation8 + $0x3b0] sm:$0xff] %v1130_v56 }
 0x23d   :  { %1182 = vst [vmem:[#allocation8 + $0x3b8] sm:$0xff] %v1132_v52  ;;  %v1135_v61 = vpop.f32.mrb[56].mxu1 }
 0x23e   :  { %v1136_v62 = vadd.f32 %v1135_v61, %v1663_v21  ;;  %v1137_v53 = vpop.f32.mrb[57].mxu1 }
 0x23f   :  { %v1138_v54 = vadd.f32 %v1137_v53, %v1665_v22 }
 0x240   :  { %1183 = vst [vmem:[#allocation8 + $0x3c0] sm:$0xff] %v1136_v62 }
 0x241   :  { %1184 = vst [vmem:[#allocation8 + $0x3c8] sm:$0xff] %v1138_v54  ;;  %v1141_v4 = vpop.f32.mrb[58].mxu1 }
 0x242   :  { %v1142_v5 = vadd.f32 %v1141_v4, %v1669_v29  ;;  %v1143_v57 = vpop.f32.mrb[59].mxu1 }
 0x243   :  { %v1144_v58 = vadd.f32 %v1143_v57, %v1671_v30 }
 0x244   :  { %1185 = vst [vmem:[#allocation8 + $0x3d0] sm:$0xff] %v1142_v5 }
 0x245   :  { %1186 = vst [vmem:[#allocation8 + $0x3d8] sm:$0xff] %v1144_v58  ;;  %v1147_v12 = vpop.f32.mrb[60].mxu1 }
 0x246   :  { %v1148_v13 = vadd.f32 %v1147_v12, %v1675_v39  ;;  %v1149_v59 = vpop.f32.mrb[61].mxu1 }
 0x247   :  { %v1150_v60 = vadd.f32 %v1149_v59, %v1677_v40 }
 0x248   :  { %1187 = vst [vmem:[#allocation8 + $0x3e0] sm:$0xff] %v1148_v13 }
 0x249   :  { %1188 = vst [vmem:[#allocation8 + $0x3e8] sm:$0xff] %v1150_v60  ;;  %v1153_v21 = vpop.f32.mrb[62].mxu1 }
 0x24a   :  { %v1154_v22 = vadd.f32 %v1153_v21, %v1681_v47  ;;  %v1155_v63 = vpop.f32.mrb[63].mxu1 }
 0x24b   :  { %v1156_v29 = vadd.f32 %v1155_v63, %v1683_v48 }
 0x24c   :  { %1189 = vst [vmem:[#allocation8 + $0x3f0] sm:$0xff] %v1154_v22 }
 0x24d   :  { %1190 = vst [vmem:[#allocation8 + $0x3f8] sm:$0xff] %v1156_v29 }
 0x24e   :  { %1359 = shalt.err (!%p1356_p0)
}
 0x24f   :  { %s1360_s27 = scalar_lea.hbm %s1801_s3, 16384 }
 0x250   :  { %p1361_p1 = scmp.ne.s32.totalorder %s1801_s3, %s1360_s27  ;;  %p1364_p2 = scmp.lt.u32.totalorder %s1360_s27, %s1801_s3 }
 0x252   :  { %p1366_p3 = pnand %p1364_p2, %p1361_p1 }
 0x254   :  { %1369 = shalt.err (!%p1366_p3)
}
 0x255   :  { %1202 = dma.vmem_to_hbm [thread:$0]  %s1197_s23, 16384, %s1801_s3, [#allocation4], %s1381_s0, %s1381_s0, %s1382_s15  }
 0x256   :  { %1374 = dma.done.wait [#allocation4], 16384  }
 0x257   :  { %1375 = vsyncadd [#allocation4], 4294950912 }
 0x258   :  { %1206 = vsyncpa [#allocation3], 1 }
 0x259   :  { %1207 = vsyncpa [#allocation6], 1 }
 0x25a   :  { %1208 = vsyncpa [#allocation4], 1 }

</bundles_post_ra>
